<compile_context>
chip_gen: v5e
topology: v5e:2x2
jax: 0.10.0
libtpu: 0.0.40
codegen_flags: <defaults>
</compile_context>

<pallas_src>
import functools

import jax
import jax.numpy as jnp
from jax.experimental import pallas as pl
from jax.experimental.pallas import tpu as pltpu


def _align(n_vocab: int, align: int = 64) -> int:
    return (n_vocab + align - 1) // align * align


def _gather_kernel(ids_ref, w_hbm_ref, out_ref, rows_vmem, row_sems, *, tok_tile: int):
    """Gather `tok_tile` embedding rows per grid step, double-buffered."""
    t = pl.program_id(0)
    n_t = pl.num_programs(0)
    slot = t % 2

    def fetch(tile_idx, slot_idx):
        # Issue all row DMAs for one tile; they run concurrently on the DMA
        # engine and all signal the same per-slot semaphore.
        base = tile_idx * tok_tile
        for j in range(tok_tile):
            row = ids_ref[base + j]
            pltpu.make_async_copy(
                w_hbm_ref.at[pl.ds(row, 1), :],
                rows_vmem.at[slot_idx, pl.ds(j, 1), :],
                row_sems.at[slot_idx],
            ).start()

    # Prime the pipeline: fetch tile 0 into slot 0 on the first step.
    @pl.when(t == 0)
    def _():
        fetch(0, 0)

    # Prefetch the NEXT tile into the other slot before waiting on this one,
    # so its gather latency overlaps with this step's wait + store.
    @pl.when(t + 1 < n_t)
    def _():
        fetch(t + 1, 1 - slot)

    # Drain the current slot's semaphore: one row-sized wait per row DMA
    # (all copies are the same size, so this accounts for every byte).
    for j in range(tok_tile):
        pltpu.make_async_copy(
            w_hbm_ref.at[pl.ds(0, 1), :],            # dummy src, shape match only
            rows_vmem.at[slot, pl.ds(j, 1), :],
            row_sems.at[slot],
        ).wait()

    # Single contiguous, lane-dense store; Pallas pipelines the (tok_tile, E)
    # block write-back to HBM against the next grid step.
    out_ref[...] = rows_vmem[slot]


def embedding_forward(x: jax.Array, weight: jax.Array, *, tok_tile: int = 32) -> jax.Array:
    """x: (B, S) int ids; weight: (V, E) float -> (B, S, E) float."""
    B, S = x.shape
    V, E = weight.shape
    N = B * S
    n_tiles = pl.cdiv(N, tok_tile)
    N_pad = n_tiles * tok_tile

    ids = x.reshape(N).astype(jnp.int32)
    # DMA safety: keep row indices in-range.  (nn.Embedding would raise on
    # out-of-range ids; ids in the aligned padding range [n_vocab, V) are
    # valid rows of the aligned table, matching the PyTorch module.)
    ids = jnp.clip(ids, 0, V - 1)
    if N_pad != N:
        ids = jnp.pad(ids, (0, N_pad - N))

    kernel = functools.partial(_gather_kernel, tok_tile=tok_tile)

    out_flat = pl.pallas_call(
        kernel,
        out_shape=jax.ShapeDtypeStruct((N_pad, E), weight.dtype),
        grid_spec=pltpu.PrefetchScalarGridSpec(
            num_scalar_prefetch=1,                  # ids -> SMEM before the grid runs
            grid=(n_tiles,),
            in_specs=[
                pl.BlockSpec(memory_space=pl.ANY),  # weight table stays in HBM
            ],
            out_specs=pl.BlockSpec((tok_tile, E), lambda t, ids: (t, 0)),
            scratch_shapes=[
                pltpu.VMEM((2, tok_tile, E), weight.dtype),   # double-buffered staging
                pltpu.SemaphoreType.DMA((2,)),                # one DMA sem per slot
            ],
        ),
        compiler_params=pltpu.CompilerParams(
            # Slot state is carried across grid steps -> sequential axis.
            dimension_semantics=("arbitrary",),
        ),
    )(ids, weight)

    if N_pad != N:
        out_flat = out_flat[:N]
    return out_flat.reshape(B, S, E)


if __name__ == "__main__":
    # config: n_vocab=1000 -> aligned vocab 1024, E=128
    n_vocab = 1000
    E = 128
    V = _align(n_vocab)

    B, S = 2, 8

    key = jax.random.PRNGKey(0)
    k_w, k_x = jax.random.split(key)
    # deterministic synthetic parameters (nn.Embedding weight ~ N(0, 1))
    weight = jax.random.normal(k_w, (V, E), dtype=jnp.float32)
    x = jax.random.randint(k_x, (B, S), minval=0, maxval=n_vocab, dtype=jnp.int32)

    # tok_tile=8 -> 2 token tiles, exercising both the priming and the
    # double-buffered prefetch path at this small test shape.
    out = embedding_forward(x, weight, tok_tile=8)
    out = jax.block_until_ready(out)

    # reference: plain gather
    ref = jnp.take(weight, x, axis=0)
    assert out.shape == (B, S, E), out.shape
    assert out.dtype == weight.dtype
    assert jnp.allclose(out, ref, atol=0.0, rtol=0.0), "mismatch vs reference gather"

    print("KERNEL_OK")
</pallas_src>

<mosaic_0001>
module attributes {stable_mosaic.version = 11 : i64} {
  func.func @_gather_kernel(%arg0: i32, %arg1: memref<16xi32, #tpu.memory_space<smem>>, %arg2: memref<1024x128xf32, #tpu.memory_space<any>>, %arg3: memref<8x128xf32, #tpu.memory_space<vmem>>, %arg4: memref<2x8x128xf32, #tpu.memory_space<vmem>>, %arg5: memref<2x!tpu.dma_semaphore, #tpu.memory_space<semaphore_mem>>) attributes {dimension_semantics = [#tpu.dimension_semantics<arbitrary>], iteration_bounds = array<i64: 2>, scalar_prefetch = 1 : i64, scratch_operands = 2 : i64, tpu.core_type = #tpu.core_type<tc>, window_params = [{}, {transform_indices = @transform_1, window_bounds = array<i64: 8, 128>}]} {
    %c2_i32 = arith.constant 2 : i32
    %c0_i32 = arith.constant 0 : i32
    %0 = arith.cmpi eq, %c2_i32, %c0_i32 : i32
    %c1_i32 = arith.constant 1 : i32
    %1 = arith.select %0, %c1_i32, %c2_i32 : i32
    %2 = arith.remsi %arg0, %1 : i32
    %c0_i32_0 = arith.constant 0 : i32
    %3 = arith.cmpi ne, %2, %c0_i32_0 : i32
    %c0_i32_1 = arith.constant 0 : i32
    %4 = arith.cmpi slt, %2, %c0_i32_1 : i32
    %c0_i32_2 = arith.constant 0 : i32
    %5 = arith.cmpi slt, %1, %c0_i32_2 : i32
    %6 = arith.xori %4, %5 : i1
    %7 = arith.andi %6, %3 : i1
    %8 = arith.addi %2, %1 : i32
    %9 = arith.select %7, %8, %2 : i32
    %c0_i32_3 = arith.constant 0 : i32
    %10 = arith.cmpi eq, %arg0, %c0_i32_3 : i32
    %11 = arith.extui %10 : i1 to i32
    %c0_i32_4 = arith.constant 0 : i32
    %12 = arith.cmpi ne, %11, %c0_i32_4 : i32
    scf.if %12 {
      %c0_38 = arith.constant 0 : index
      %61 = memref.load %arg1[%c0_38] : memref<16xi32, #tpu.memory_space<smem>>
      %c0_i32_39 = arith.constant 0 : i32
      %c0_i32_40 = arith.constant 0 : i32
      %c0_i32_41 = arith.constant 0 : i32
      %62 = tpu.memref_slice %arg2[%61, %c0_i32_41] : memref<1024x128xf32, #tpu.memory_space<any>> -> memref<1x128xf32, #tpu.memory_space<any>>
      %c0_i32_42 = arith.constant 0 : i32
      %c0_i32_43 = arith.constant 0 : i32
      %63 = tpu.memref_slice %arg4[%c0_i32_39, %c0_i32_42, %c0_i32_43] : memref<2x8x128xf32, #tpu.memory_space<vmem>> -> memref<1x1x128xf32, #tpu.memory_space<vmem>>
      %64 = tpu.memref_squeeze %63 : memref<1x1x128xf32, #tpu.memory_space<vmem>> -> memref<1x128xf32, #tpu.memory_space<vmem>>
      %65 = tpu.memref_slice %arg5[%c0_i32_40] : memref<2x!tpu.dma_semaphore, #tpu.memory_space<semaphore_mem>> -> memref<1x!tpu.dma_semaphore, #tpu.memory_space<semaphore_mem>>
      %66 = tpu.memref_squeeze %65 : memref<1x!tpu.dma_semaphore, #tpu.memory_space<semaphore_mem>> -> memref<!tpu.dma_semaphore, #tpu.memory_space<semaphore_mem>>
      tpu.enqueue_dma source(%62 : memref<1x128xf32, #tpu.memory_space<any>>) target(%64 : memref<1x128xf32, #tpu.memory_space<vmem>>) target_semaphore(%66 : memref<!tpu.dma_semaphore, #tpu.memory_space<semaphore_mem>>)
      %c1 = arith.constant 1 : index
      %67 = memref.load %arg1[%c1] : memref<16xi32, #tpu.memory_space<smem>>
      %c0_i32_44 = arith.constant 0 : i32
      %c0_i32_45 = arith.constant 0 : i32
      %c0_i32_46 = arith.constant 0 : i32
      %68 = tpu.memref_slice %arg2[%67, %c0_i32_46] : memref<1024x128xf32, #tpu.memory_space<any>> -> memref<1x128xf32, #tpu.memory_space<any>>
      %c1_i32_47 = arith.constant 1 : i32
      %c0_i32_48 = arith.constant 0 : i32
      %69 = tpu.memref_slice %arg4[%c0_i32_44, %c1_i32_47, %c0_i32_48] : memref<2x8x128xf32, #tpu.memory_space<vmem>> -> memref<1x1x128xf32, #tpu.memory_space<vmem>>
      %70 = tpu.memref_squeeze %69 : memref<1x1x128xf32, #tpu.memory_space<vmem>> -> memref<1x128xf32, #tpu.memory_space<vmem>>
      %71 = tpu.memref_slice %arg5[%c0_i32_45] : memref<2x!tpu.dma_semaphore, #tpu.memory_space<semaphore_mem>> -> memref<1x!tpu.dma_semaphore, #tpu.memory_space<semaphore_mem>>
      %72 = tpu.memref_squeeze %71 : memref<1x!tpu.dma_semaphore, #tpu.memory_space<semaphore_mem>> -> memref<!tpu.dma_semaphore, #tpu.memory_space<semaphore_mem>>
      tpu.enqueue_dma source(%68 : memref<1x128xf32, #tpu.memory_space<any>>) target(%70 : memref<1x128xf32, #tpu.memory_space<vmem>>) target_semaphore(%72 : memref<!tpu.dma_semaphore, #tpu.memory_space<semaphore_mem>>)
      %c2 = arith.constant 2 : index
      %73 = memref.load %arg1[%c2] : memref<16xi32, #tpu.memory_space<smem>>
      %c0_i32_49 = arith.constant 0 : i32
      %c0_i32_50 = arith.constant 0 : i32
      %c0_i32_51 = arith.constant 0 : i32
      %74 = tpu.memref_slice %arg2[%73, %c0_i32_51] : memref<1024x128xf32, #tpu.memory_space<any>> -> memref<1x128xf32, #tpu.memory_space<any>>
      %c2_i32_52 = arith.constant 2 : i32
      %c0_i32_53 = arith.constant 0 : i32
      %75 = tpu.memref_slice %arg4[%c0_i32_49, %c2_i32_52, %c0_i32_53] : memref<2x8x128xf32, #tpu.memory_space<vmem>> -> memref<1x1x128xf32, #tpu.memory_space<vmem>>
      %76 = tpu.memref_squeeze %75 : memref<1x1x128xf32, #tpu.memory_space<vmem>> -> memref<1x128xf32, #tpu.memory_space<vmem>>
      %77 = tpu.memref_slice %arg5[%c0_i32_50] : memref<2x!tpu.dma_semaphore, #tpu.memory_space<semaphore_mem>> -> memref<1x!tpu.dma_semaphore, #tpu.memory_space<semaphore_mem>>
      %78 = tpu.memref_squeeze %77 : memref<1x!tpu.dma_semaphore, #tpu.memory_space<semaphore_mem>> -> memref<!tpu.dma_semaphore, #tpu.memory_space<semaphore_mem>>
      tpu.enqueue_dma source(%74 : memref<1x128xf32, #tpu.memory_space<any>>) target(%76 : memref<1x128xf32, #tpu.memory_space<vmem>>) target_semaphore(%78 : memref<!tpu.dma_semaphore, #tpu.memory_space<semaphore_mem>>)
      %c3 = arith.constant 3 : index
      %79 = memref.load %arg1[%c3] : memref<16xi32, #tpu.memory_space<smem>>
      %c0_i32_54 = arith.constant 0 : i32
      %c0_i32_55 = arith.constant 0 : i32
      %c0_i32_56 = arith.constant 0 : i32
      %80 = tpu.memref_slice %arg2[%79, %c0_i32_56] : memref<1024x128xf32, #tpu.memory_space<any>> -> memref<1x128xf32, #tpu.memory_space<any>>
      %c3_i32_57 = arith.constant 3 : i32
      %c0_i32_58 = arith.constant 0 : i32
      %81 = tpu.memref_slice %arg4[%c0_i32_54, %c3_i32_57, %c0_i32_58] : memref<2x8x128xf32, #tpu.memory_space<vmem>> -> memref<1x1x128xf32, #tpu.memory_space<vmem>>
      %82 = tpu.memref_squeeze %81 : memref<1x1x128xf32, #tpu.memory_space<vmem>> -> memref<1x128xf32, #tpu.memory_space<vmem>>
      %83 = tpu.memref_slice %arg5[%c0_i32_55] : memref<2x!tpu.dma_semaphore, #tpu.memory_space<semaphore_mem>> -> memref<1x!tpu.dma_semaphore, #tpu.memory_space<semaphore_mem>>
      %84 = tpu.memref_squeeze %83 : memref<1x!tpu.dma_semaphore, #tpu.memory_space<semaphore_mem>> -> memref<!tpu.dma_semaphore, #tpu.memory_space<semaphore_mem>>
      tpu.enqueue_dma source(%80 : memref<1x128xf32, #tpu.memory_space<any>>) target(%82 : memref<1x128xf32, #tpu.memory_space<vmem>>) target_semaphore(%84 : memref<!tpu.dma_semaphore, #tpu.memory_space<semaphore_mem>>)
      %c4 = arith.constant 4 : index
      %85 = memref.load %arg1[%c4] : memref<16xi32, #tpu.memory_space<smem>>
      %c0_i32_59 = arith.constant 0 : i32
      %c0_i32_60 = arith.constant 0 : i32
      %c0_i32_61 = arith.constant 0 : i32
      %86 = tpu.memref_slice %arg2[%85, %c0_i32_61] : memref<1024x128xf32, #tpu.memory_space<any>> -> memref<1x128xf32, #tpu.memory_space<any>>
      %c4_i32_62 = arith.constant 4 : i32
      %c0_i32_63 = arith.constant 0 : i32
      %87 = tpu.memref_slice %arg4[%c0_i32_59, %c4_i32_62, %c0_i32_63] : memref<2x8x128xf32, #tpu.memory_space<vmem>> -> memref<1x1x128xf32, #tpu.memory_space<vmem>>
      %88 = tpu.memref_squeeze %87 : memref<1x1x128xf32, #tpu.memory_space<vmem>> -> memref<1x128xf32, #tpu.memory_space<vmem>>
      %89 = tpu.memref_slice %arg5[%c0_i32_60] : memref<2x!tpu.dma_semaphore, #tpu.memory_space<semaphore_mem>> -> memref<1x!tpu.dma_semaphore, #tpu.memory_space<semaphore_mem>>
      %90 = tpu.memref_squeeze %89 : memref<1x!tpu.dma_semaphore, #tpu.memory_space<semaphore_mem>> -> memref<!tpu.dma_semaphore, #tpu.memory_space<semaphore_mem>>
      tpu.enqueue_dma source(%86 : memref<1x128xf32, #tpu.memory_space<any>>) target(%88 : memref<1x128xf32, #tpu.memory_space<vmem>>) target_semaphore(%90 : memref<!tpu.dma_semaphore, #tpu.memory_space<semaphore_mem>>)
      %c5 = arith.constant 5 : index
      %91 = memref.load %arg1[%c5] : memref<16xi32, #tpu.memory_space<smem>>
      %c0_i32_64 = arith.constant 0 : i32
      %c0_i32_65 = arith.constant 0 : i32
      %c0_i32_66 = arith.constant 0 : i32
      %92 = tpu.memref_slice %arg2[%91, %c0_i32_66] : memref<1024x128xf32, #tpu.memory_space<any>> -> memref<1x128xf32, #tpu.memory_space<any>>
      %c5_i32_67 = arith.constant 5 : i32
      %c0_i32_68 = arith.constant 0 : i32
      %93 = tpu.memref_slice %arg4[%c0_i32_64, %c5_i32_67, %c0_i32_68] : memref<2x8x128xf32, #tpu.memory_space<vmem>> -> memref<1x1x128xf32, #tpu.memory_space<vmem>>
      %94 = tpu.memref_squeeze %93 : memref<1x1x128xf32, #tpu.memory_space<vmem>> -> memref<1x128xf32, #tpu.memory_space<vmem>>
      %95 = tpu.memref_slice %arg5[%c0_i32_65] : memref<2x!tpu.dma_semaphore, #tpu.memory_space<semaphore_mem>> -> memref<1x!tpu.dma_semaphore, #tpu.memory_space<semaphore_mem>>
      %96 = tpu.memref_squeeze %95 : memref<1x!tpu.dma_semaphore, #tpu.memory_space<semaphore_mem>> -> memref<!tpu.dma_semaphore, #tpu.memory_space<semaphore_mem>>
      tpu.enqueue_dma source(%92 : memref<1x128xf32, #tpu.memory_space<any>>) target(%94 : memref<1x128xf32, #tpu.memory_space<vmem>>) target_semaphore(%96 : memref<!tpu.dma_semaphore, #tpu.memory_space<semaphore_mem>>)
      %c6 = arith.constant 6 : index
      %97 = memref.load %arg1[%c6] : memref<16xi32, #tpu.memory_space<smem>>
      %c0_i32_69 = arith.constant 0 : i32
      %c0_i32_70 = arith.constant 0 : i32
      %c0_i32_71 = arith.constant 0 : i32
      %98 = tpu.memref_slice %arg2[%97, %c0_i32_71] : memref<1024x128xf32, #tpu.memory_space<any>> -> memref<1x128xf32, #tpu.memory_space<any>>
      %c6_i32_72 = arith.constant 6 : i32
      %c0_i32_73 = arith.constant 0 : i32
      %99 = tpu.memref_slice %arg4[%c0_i32_69, %c6_i32_72, %c0_i32_73] : memref<2x8x128xf32, #tpu.memory_space<vmem>> -> memref<1x1x128xf32, #tpu.memory_space<vmem>>
      %100 = tpu.memref_squeeze %99 : memref<1x1x128xf32, #tpu.memory_space<vmem>> -> memref<1x128xf32, #tpu.memory_space<vmem>>
      %101 = tpu.memref_slice %arg5[%c0_i32_70] : memref<2x!tpu.dma_semaphore, #tpu.memory_space<semaphore_mem>> -> memref<1x!tpu.dma_semaphore, #tpu.memory_space<semaphore_mem>>
      %102 = tpu.memref_squeeze %101 : memref<1x!tpu.dma_semaphore, #tpu.memory_space<semaphore_mem>> -> memref<!tpu.dma_semaphore, #tpu.memory_space<semaphore_mem>>
      tpu.enqueue_dma source(%98 : memref<1x128xf32, #tpu.memory_space<any>>) target(%100 : memref<1x128xf32, #tpu.memory_space<vmem>>) target_semaphore(%102 : memref<!tpu.dma_semaphore, #tpu.memory_space<semaphore_mem>>)
      %c7 = arith.constant 7 : index
      %103 = memref.load %arg1[%c7] : memref<16xi32, #tpu.memory_space<smem>>
      %c0_i32_74 = arith.constant 0 : i32
      %c0_i32_75 = arith.constant 0 : i32
      %c0_i32_76 = arith.constant 0 : i32
      %104 = tpu.memref_slice %arg2[%103, %c0_i32_76] : memref<1024x128xf32, #tpu.memory_space<any>> -> memref<1x128xf32, #tpu.memory_space<any>>
      %c7_i32_77 = arith.constant 7 : i32
      %c0_i32_78 = arith.constant 0 : i32
      %105 = tpu.memref_slice %arg4[%c0_i32_74, %c7_i32_77, %c0_i32_78] : memref<2x8x128xf32, #tpu.memory_space<vmem>> -> memref<1x1x128xf32, #tpu.memory_space<vmem>>
      %106 = tpu.memref_squeeze %105 : memref<1x1x128xf32, #tpu.memory_space<vmem>> -> memref<1x128xf32, #tpu.memory_space<vmem>>
      %107 = tpu.memref_slice %arg5[%c0_i32_75] : memref<2x!tpu.dma_semaphore, #tpu.memory_space<semaphore_mem>> -> memref<1x!tpu.dma_semaphore, #tpu.memory_space<semaphore_mem>>
      %108 = tpu.memref_squeeze %107 : memref<1x!tpu.dma_semaphore, #tpu.memory_space<semaphore_mem>> -> memref<!tpu.dma_semaphore, #tpu.memory_space<semaphore_mem>>
      tpu.enqueue_dma source(%104 : memref<1x128xf32, #tpu.memory_space<any>>) target(%106 : memref<1x128xf32, #tpu.memory_space<vmem>>) target_semaphore(%108 : memref<!tpu.dma_semaphore, #tpu.memory_space<semaphore_mem>>)
    } else {
    }
    %c1_i32_5 = arith.constant 1 : i32
    %13 = arith.addi %arg0, %c1_i32_5 : i32
    %c2_i32_6 = arith.constant 2 : i32
    %14 = arith.cmpi slt, %13, %c2_i32_6 : i32
    %15 = arith.extui %14 : i1 to i32
    %c0_i32_7 = arith.constant 0 : i32
    %16 = arith.cmpi ne, %15, %c0_i32_7 : i32
    scf.if %16 {
      %c1_i32_38 = arith.constant 1 : i32
      %61 = arith.addi %arg0, %c1_i32_38 : i32
      %c1_i32_39 = arith.constant 1 : i32
      %62 = arith.subi %c1_i32_39, %9 : i32
      %c8_i32 = arith.constant 8 : i32
      %63 = arith.muli %61, %c8_i32 : i32
      %c0_i32_40 = arith.constant 0 : i32
      %64 = arith.addi %63, %c0_i32_40 : i32
      %65 = arith.index_cast %64 : i32 to index
      %66 = memref.load %arg1[%65] : memref<16xi32, #tpu.memory_space<smem>>
      %c0_i32_41 = arith.constant 0 : i32
      %67 = tpu.memref_slice %arg2[%66, %c0_i32_41] : memref<1024x128xf32, #tpu.memory_space<any>> -> memref<1x128xf32, #tpu.memory_space<any>>
      %c0_i32_42 = arith.constant 0 : i32
      %c0_i32_43 = arith.constant 0 : i32
      %68 = tpu.memref_slice %arg4[%62, %c0_i32_42, %c0_i32_43] : memref<2x8x128xf32, #tpu.memory_space<vmem>> -> memref<1x1x128xf32, #tpu.memory_space<vmem>>
      %69 = tpu.memref_squeeze %68 : memref<1x1x128xf32, #tpu.memory_space<vmem>> -> memref<1x128xf32, #tpu.memory_space<vmem>>
      %70 = tpu.memref_slice %arg5[%62] : memref<2x!tpu.dma_semaphore, #tpu.memory_space<semaphore_mem>> -> memref<1x!tpu.dma_semaphore, #tpu.memory_space<semaphore_mem>>
      %71 = tpu.memref_squeeze %70 : memref<1x!tpu.dma_semaphore, #tpu.memory_space<semaphore_mem>> -> memref<!tpu.dma_semaphore, #tpu.memory_space<semaphore_mem>>
      tpu.enqueue_dma source(%67 : memref<1x128xf32, #tpu.memory_space<any>>) target(%69 : memref<1x128xf32, #tpu.memory_space<vmem>>) target_semaphore(%71 : memref<!tpu.dma_semaphore, #tpu.memory_space<semaphore_mem>>)
      %c1_i32_44 = arith.constant 1 : i32
      %72 = arith.addi %63, %c1_i32_44 : i32
      %73 = arith.index_cast %72 : i32 to index
      %74 = memref.load %arg1[%73] : memref<16xi32, #tpu.memory_space<smem>>
      %c0_i32_45 = arith.constant 0 : i32
      %75 = tpu.memref_slice %arg2[%74, %c0_i32_45] : memref<1024x128xf32, #tpu.memory_space<any>> -> memref<1x128xf32, #tpu.memory_space<any>>
      %c1_i32_46 = arith.constant 1 : i32
      %c0_i32_47 = arith.constant 0 : i32
      %76 = tpu.memref_slice %arg4[%62, %c1_i32_46, %c0_i32_47] : memref<2x8x128xf32, #tpu.memory_space<vmem>> -> memref<1x1x128xf32, #tpu.memory_space<vmem>>
      %77 = tpu.memref_squeeze %76 : memref<1x1x128xf32, #tpu.memory_space<vmem>> -> memref<1x128xf32, #tpu.memory_space<vmem>>
      %78 = tpu.memref_slice %arg5[%62] : memref<2x!tpu.dma_semaphore, #tpu.memory_space<semaphore_mem>> -> memref<1x!tpu.dma_semaphore, #tpu.memory_space<semaphore_mem>>
      %79 = tpu.memref_squeeze %78 : memref<1x!tpu.dma_semaphore, #tpu.memory_space<semaphore_mem>> -> memref<!tpu.dma_semaphore, #tpu.memory_space<semaphore_mem>>
      tpu.enqueue_dma source(%75 : memref<1x128xf32, #tpu.memory_space<any>>) target(%77 : memref<1x128xf32, #tpu.memory_space<vmem>>) target_semaphore(%79 : memref<!tpu.dma_semaphore, #tpu.memory_space<semaphore_mem>>)
      %c2_i32_48 = arith.constant 2 : i32
      %80 = arith.addi %63, %c2_i32_48 : i32
      %81 = arith.index_cast %80 : i32 to index
      %82 = memref.load %arg1[%81] : memref<16xi32, #tpu.memory_space<smem>>
      %c0_i32_49 = arith.constant 0 : i32
      %83 = tpu.memref_slice %arg2[%82, %c0_i32_49] : memref<1024x128xf32, #tpu.memory_space<any>> -> memref<1x128xf32, #tpu.memory_space<any>>
      %c2_i32_50 = arith.constant 2 : i32
      %c0_i32_51 = arith.constant 0 : i32
      %84 = tpu.memref_slice %arg4[%62, %c2_i32_50, %c0_i32_51] : memref<2x8x128xf32, #tpu.memory_space<vmem>> -> memref<1x1x128xf32, #tpu.memory_space<vmem>>
      %85 = tpu.memref_squeeze %84 : memref<1x1x128xf32, #tpu.memory_space<vmem>> -> memref<1x128xf32, #tpu.memory_space<vmem>>
      %86 = tpu.memref_slice %arg5[%62] : memref<2x!tpu.dma_semaphore, #tpu.memory_space<semaphore_mem>> -> memref<1x!tpu.dma_semaphore, #tpu.memory_space<semaphore_mem>>
      %87 = tpu.memref_squeeze %86 : memref<1x!tpu.dma_semaphore, #tpu.memory_space<semaphore_mem>> -> memref<!tpu.dma_semaphore, #tpu.memory_space<semaphore_mem>>
      tpu.enqueue_dma source(%83 : memref<1x128xf32, #tpu.memory_space<any>>) target(%85 : memref<1x128xf32, #tpu.memory_space<vmem>>) target_semaphore(%87 : memref<!tpu.dma_semaphore, #tpu.memory_space<semaphore_mem>>)
      %c3_i32_52 = arith.constant 3 : i32
      %88 = arith.addi %63, %c3_i32_52 : i32
      %89 = arith.index_cast %88 : i32 to index
      %90 = memref.load %arg1[%89] : memref<16xi32, #tpu.memory_space<smem>>
      %c0_i32_53 = arith.constant 0 : i32
      %91 = tpu.memref_slice %arg2[%90, %c0_i32_53] : memref<1024x128xf32, #tpu.memory_space<any>> -> memref<1x128xf32, #tpu.memory_space<any>>
      %c3_i32_54 = arith.constant 3 : i32
      %c0_i32_55 = arith.constant 0 : i32
      %92 = tpu.memref_slice %arg4[%62, %c3_i32_54, %c0_i32_55] : memref<2x8x128xf32, #tpu.memory_space<vmem>> -> memref<1x1x128xf32, #tpu.memory_space<vmem>>
      %93 = tpu.memref_squeeze %92 : memref<1x1x128xf32, #tpu.memory_space<vmem>> -> memref<1x128xf32, #tpu.memory_space<vmem>>
      %94 = tpu.memref_slice %arg5[%62] : memref<2x!tpu.dma_semaphore, #tpu.memory_space<semaphore_mem>> -> memref<1x!tpu.dma_semaphore, #tpu.memory_space<semaphore_mem>>
      %95 = tpu.memref_squeeze %94 : memref<1x!tpu.dma_semaphore, #tpu.memory_space<semaphore_mem>> -> memref<!tpu.dma_semaphore, #tpu.memory_space<semaphore_mem>>
      tpu.enqueue_dma source(%91 : memref<1x128xf32, #tpu.memory_space<any>>) target(%93 : memref<1x128xf32, #tpu.memory_space<vmem>>) target_semaphore(%95 : memref<!tpu.dma_semaphore, #tpu.memory_space<semaphore_mem>>)
      %c4_i32_56 = arith.constant 4 : i32
      %96 = arith.addi %63, %c4_i32_56 : i32
      %97 = arith.index_cast %96 : i32 to index
      %98 = memref.load %arg1[%97] : memref<16xi32, #tpu.memory_space<smem>>
      %c0_i32_57 = arith.constant 0 : i32
      %99 = tpu.memref_slice %arg2[%98, %c0_i32_57] : memref<1024x128xf32, #tpu.memory_space<any>> -> memref<1x128xf32, #tpu.memory_space<any>>
      %c4_i32_58 = arith.constant 4 : i32
      %c0_i32_59 = arith.constant 0 : i32
      %100 = tpu.memref_slice %arg4[%62, %c4_i32_58, %c0_i32_59] : memref<2x8x128xf32, #tpu.memory_space<vmem>> -> memref<1x1x128xf32, #tpu.memory_space<vmem>>
      %101 = tpu.memref_squeeze %100 : memref<1x1x128xf32, #tpu.memory_space<vmem>> -> memref<1x128xf32, #tpu.memory_space<vmem>>
      %102 = tpu.memref_slice %arg5[%62] : memref<2x!tpu.dma_semaphore, #tpu.memory_space<semaphore_mem>> -> memref<1x!tpu.dma_semaphore, #tpu.memory_space<semaphore_mem>>
      %103 = tpu.memref_squeeze %102 : memref<1x!tpu.dma_semaphore, #tpu.memory_space<semaphore_mem>> -> memref<!tpu.dma_semaphore, #tpu.memory_space<semaphore_mem>>
      tpu.enqueue_dma source(%99 : memref<1x128xf32, #tpu.memory_space<any>>) target(%101 : memref<1x128xf32, #tpu.memory_space<vmem>>) target_semaphore(%103 : memref<!tpu.dma_semaphore, #tpu.memory_space<semaphore_mem>>)
      %c5_i32_60 = arith.constant 5 : i32
      %104 = arith.addi %63, %c5_i32_60 : i32
      %105 = arith.index_cast %104 : i32 to index
      %106 = memref.load %arg1[%105] : memref<16xi32, #tpu.memory_space<smem>>
      %c0_i32_61 = arith.constant 0 : i32
      %107 = tpu.memref_slice %arg2[%106, %c0_i32_61] : memref<1024x128xf32, #tpu.memory_space<any>> -> memref<1x128xf32, #tpu.memory_space<any>>
      %c5_i32_62 = arith.constant 5 : i32
      %c0_i32_63 = arith.constant 0 : i32
      %108 = tpu.memref_slice %arg4[%62, %c5_i32_62, %c0_i32_63] : memref<2x8x128xf32, #tpu.memory_space<vmem>> -> memref<1x1x128xf32, #tpu.memory_space<vmem>>
      %109 = tpu.memref_squeeze %108 : memref<1x1x128xf32, #tpu.memory_space<vmem>> -> memref<1x128xf32, #tpu.memory_space<vmem>>
      %110 = tpu.memref_slice %arg5[%62] : memref<2x!tpu.dma_semaphore, #tpu.memory_space<semaphore_mem>> -> memref<1x!tpu.dma_semaphore, #tpu.memory_space<semaphore_mem>>
      %111 = tpu.memref_squeeze %110 : memref<1x!tpu.dma_semaphore, #tpu.memory_space<semaphore_mem>> -> memref<!tpu.dma_semaphore, #tpu.memory_space<semaphore_mem>>
      tpu.enqueue_dma source(%107 : memref<1x128xf32, #tpu.memory_space<any>>) target(%109 : memref<1x128xf32, #tpu.memory_space<vmem>>) target_semaphore(%111 : memref<!tpu.dma_semaphore, #tpu.memory_space<semaphore_mem>>)
      %c6_i32_64 = arith.constant 6 : i32
      %112 = arith.addi %63, %c6_i32_64 : i32
      %113 = arith.index_cast %112 : i32 to index
      %114 = memref.load %arg1[%113] : memref<16xi32, #tpu.memory_space<smem>>
      %c0_i32_65 = arith.constant 0 : i32
      %115 = tpu.memref_slice %arg2[%114, %c0_i32_65] : memref<1024x128xf32, #tpu.memory_space<any>> -> memref<1x128xf32, #tpu.memory_space<any>>
      %c6_i32_66 = arith.constant 6 : i32
      %c0_i32_67 = arith.constant 0 : i32
      %116 = tpu.memref_slice %arg4[%62, %c6_i32_66, %c0_i32_67] : memref<2x8x128xf32, #tpu.memory_space<vmem>> -> memref<1x1x128xf32, #tpu.memory_space<vmem>>
      %117 = tpu.memref_squeeze %116 : memref<1x1x128xf32, #tpu.memory_space<vmem>> -> memref<1x128xf32, #tpu.memory_space<vmem>>
      %118 = tpu.memref_slice %arg5[%62] : memref<2x!tpu.dma_semaphore, #tpu.memory_space<semaphore_mem>> -> memref<1x!tpu.dma_semaphore, #tpu.memory_space<semaphore_mem>>
      %119 = tpu.memref_squeeze %118 : memref<1x!tpu.dma_semaphore, #tpu.memory_space<semaphore_mem>> -> memref<!tpu.dma_semaphore, #tpu.memory_space<semaphore_mem>>
      tpu.enqueue_dma source(%115 : memref<1x128xf32, #tpu.memory_space<any>>) target(%117 : memref<1x128xf32, #tpu.memory_space<vmem>>) target_semaphore(%119 : memref<!tpu.dma_semaphore, #tpu.memory_space<semaphore_mem>>)
      %c7_i32_68 = arith.constant 7 : i32
      %120 = arith.addi %63, %c7_i32_68 : i32
      %121 = arith.index_cast %120 : i32 to index
      %122 = memref.load %arg1[%121] : memref<16xi32, #tpu.memory_space<smem>>
      %c0_i32_69 = arith.constant 0 : i32
      %123 = tpu.memref_slice %arg2[%122, %c0_i32_69] : memref<1024x128xf32, #tpu.memory_space<any>> -> memref<1x128xf32, #tpu.memory_space<any>>
      %c7_i32_70 = arith.constant 7 : i32
      %c0_i32_71 = arith.constant 0 : i32
      %124 = tpu.memref_slice %arg4[%62, %c7_i32_70, %c0_i32_71] : memref<2x8x128xf32, #tpu.memory_space<vmem>> -> memref<1x1x128xf32, #tpu.memory_space<vmem>>
      %125 = tpu.memref_squeeze %124 : memref<1x1x128xf32, #tpu.memory_space<vmem>> -> memref<1x128xf32, #tpu.memory_space<vmem>>
      %126 = tpu.memref_slice %arg5[%62] : memref<2x!tpu.dma_semaphore, #tpu.memory_space<semaphore_mem>> -> memref<1x!tpu.dma_semaphore, #tpu.memory_space<semaphore_mem>>
      %127 = tpu.memref_squeeze %126 : memref<1x!tpu.dma_semaphore, #tpu.memory_space<semaphore_mem>> -> memref<!tpu.dma_semaphore, #tpu.memory_space<semaphore_mem>>
      tpu.enqueue_dma source(%123 : memref<1x128xf32, #tpu.memory_space<any>>) target(%125 : memref<1x128xf32, #tpu.memory_space<vmem>>) target_semaphore(%127 : memref<!tpu.dma_semaphore, #tpu.memory_space<semaphore_mem>>)
    } else {
    }
    %c0_i32_8 = arith.constant 0 : i32
    %c0_i32_9 = arith.constant 0 : i32
    %17 = tpu.memref_slice %arg2[%c0_i32_8, %c0_i32_9] : memref<1024x128xf32, #tpu.memory_space<any>> -> memref<1x128xf32, #tpu.memory_space<any>>
    %c0_i32_10 = arith.constant 0 : i32
    %c0_i32_11 = arith.constant 0 : i32
    %18 = tpu.memref_slice %arg4[%9, %c0_i32_10, %c0_i32_11] : memref<2x8x128xf32, #tpu.memory_space<vmem>> -> memref<1x1x128xf32, #tpu.memory_space<vmem>>
    %19 = tpu.memref_squeeze %18 : memref<1x1x128xf32, #tpu.memory_space<vmem>> -> memref<1x128xf32, #tpu.memory_space<vmem>>
    %20 = tpu.memref_slice %arg5[%9] : memref<2x!tpu.dma_semaphore, #tpu.memory_space<semaphore_mem>> -> memref<1x!tpu.dma_semaphore, #tpu.memory_space<semaphore_mem>>
    %21 = tpu.memref_squeeze %20 : memref<1x!tpu.dma_semaphore, #tpu.memory_space<semaphore_mem>> -> memref<!tpu.dma_semaphore, #tpu.memory_space<semaphore_mem>>
    tpu.wait_dma2 semaphore(%21 : memref<!tpu.dma_semaphore, #tpu.memory_space<semaphore_mem>>) src(%17 : memref<1x128xf32, #tpu.memory_space<any>>) dst(%19 : memref<1x128xf32, #tpu.memory_space<vmem>>)
    %c0_i32_12 = arith.constant 0 : i32
    %c0_i32_13 = arith.constant 0 : i32
    %22 = tpu.memref_slice %arg2[%c0_i32_12, %c0_i32_13] : memref<1024x128xf32, #tpu.memory_space<any>> -> memref<1x128xf32, #tpu.memory_space<any>>
    %c1_i32_14 = arith.constant 1 : i32
    %c0_i32_15 = arith.constant 0 : i32
    %23 = tpu.memref_slice %arg4[%9, %c1_i32_14, %c0_i32_15] : memref<2x8x128xf32, #tpu.memory_space<vmem>> -> memref<1x1x128xf32, #tpu.memory_space<vmem>>
    %24 = tpu.memref_squeeze %23 : memref<1x1x128xf32, #tpu.memory_space<vmem>> -> memref<1x128xf32, #tpu.memory_space<vmem>>
    %25 = tpu.memref_slice %arg5[%9] : memref<2x!tpu.dma_semaphore, #tpu.memory_space<semaphore_mem>> -> memref<1x!tpu.dma_semaphore, #tpu.memory_space<semaphore_mem>>
    %26 = tpu.memref_squeeze %25 : memref<1x!tpu.dma_semaphore, #tpu.memory_space<semaphore_mem>> -> memref<!tpu.dma_semaphore, #tpu.memory_space<semaphore_mem>>
    tpu.wait_dma2 semaphore(%26 : memref<!tpu.dma_semaphore, #tpu.memory_space<semaphore_mem>>) src(%22 : memref<1x128xf32, #tpu.memory_space<any>>) dst(%24 : memref<1x128xf32, #tpu.memory_space<vmem>>)
    %c0_i32_16 = arith.constant 0 : i32
    %c0_i32_17 = arith.constant 0 : i32
    %27 = tpu.memref_slice %arg2[%c0_i32_16, %c0_i32_17] : memref<1024x128xf32, #tpu.memory_space<any>> -> memref<1x128xf32, #tpu.memory_space<any>>
    %c2_i32_18 = arith.constant 2 : i32
    %c0_i32_19 = arith.constant 0 : i32
    %28 = tpu.memref_slice %arg4[%9, %c2_i32_18, %c0_i32_19] : memref<2x8x128xf32, #tpu.memory_space<vmem>> -> memref<1x1x128xf32, #tpu.memory_space<vmem>>
    %29 = tpu.memref_squeeze %28 : memref<1x1x128xf32, #tpu.memory_space<vmem>> -> memref<1x128xf32, #tpu.memory_space<vmem>>
    %30 = tpu.memref_slice %arg5[%9] : memref<2x!tpu.dma_semaphore, #tpu.memory_space<semaphore_mem>> -> memref<1x!tpu.dma_semaphore, #tpu.memory_space<semaphore_mem>>
    %31 = tpu.memref_squeeze %30 : memref<1x!tpu.dma_semaphore, #tpu.memory_space<semaphore_mem>> -> memref<!tpu.dma_semaphore, #tpu.memory_space<semaphore_mem>>
    tpu.wait_dma2 semaphore(%31 : memref<!tpu.dma_semaphore, #tpu.memory_space<semaphore_mem>>) src(%27 : memref<1x128xf32, #tpu.memory_space<any>>) dst(%29 : memref<1x128xf32, #tpu.memory_space<vmem>>)
    %c0_i32_20 = arith.constant 0 : i32
    %c0_i32_21 = arith.constant 0 : i32
    %32 = tpu.memref_slice %arg2[%c0_i32_20, %c0_i32_21] : memref<1024x128xf32, #tpu.memory_space<any>> -> memref<1x128xf32, #tpu.memory_space<any>>
    %c3_i32 = arith.constant 3 : i32
    %c0_i32_22 = arith.constant 0 : i32
    %33 = tpu.memref_slice %arg4[%9, %c3_i32, %c0_i32_22] : memref<2x8x128xf32, #tpu.memory_space<vmem>> -> memref<1x1x128xf32, #tpu.memory_space<vmem>>
    %34 = tpu.memref_squeeze %33 : memref<1x1x128xf32, #tpu.memory_space<vmem>> -> memref<1x128xf32, #tpu.memory_space<vmem>>
    %35 = tpu.memref_slice %arg5[%9] : memref<2x!tpu.dma_semaphore, #tpu.memory_space<semaphore_mem>> -> memref<1x!tpu.dma_semaphore, #tpu.memory_space<semaphore_mem>>
    %36 = tpu.memref_squeeze %35 : memref<1x!tpu.dma_semaphore, #tpu.memory_space<semaphore_mem>> -> memref<!tpu.dma_semaphore, #tpu.memory_space<semaphore_mem>>
    tpu.wait_dma2 semaphore(%36 : memref<!tpu.dma_semaphore, #tpu.memory_space<semaphore_mem>>) src(%32 : memref<1x128xf32, #tpu.memory_space<any>>) dst(%34 : memref<1x128xf32, #tpu.memory_space<vmem>>)
    %c0_i32_23 = arith.constant 0 : i32
    %c0_i32_24 = arith.constant 0 : i32
    %37 = tpu.memref_slice %arg2[%c0_i32_23, %c0_i32_24] : memref<1024x128xf32, #tpu.memory_space<any>> -> memref<1x128xf32, #tpu.memory_space<any>>
    %c4_i32 = arith.constant 4 : i32
    %c0_i32_25 = arith.constant 0 : i32
    %38 = tpu.memref_slice %arg4[%9, %c4_i32, %c0_i32_25] : memref<2x8x128xf32, #tpu.memory_space<vmem>> -> memref<1x1x128xf32, #tpu.memory_space<vmem>>
    %39 = tpu.memref_squeeze %38 : memref<1x1x128xf32, #tpu.memory_space<vmem>> -> memref<1x128xf32, #tpu.memory_space<vmem>>
    %40 = tpu.memref_slice %arg5[%9] : memref<2x!tpu.dma_semaphore, #tpu.memory_space<semaphore_mem>> -> memref<1x!tpu.dma_semaphore, #tpu.memory_space<semaphore_mem>>
    %41 = tpu.memref_squeeze %40 : memref<1x!tpu.dma_semaphore, #tpu.memory_space<semaphore_mem>> -> memref<!tpu.dma_semaphore, #tpu.memory_space<semaphore_mem>>
    tpu.wait_dma2 semaphore(%41 : memref<!tpu.dma_semaphore, #tpu.memory_space<semaphore_mem>>) src(%37 : memref<1x128xf32, #tpu.memory_space<any>>) dst(%39 : memref<1x128xf32, #tpu.memory_space<vmem>>)
    %c0_i32_26 = arith.constant 0 : i32
    %c0_i32_27 = arith.constant 0 : i32
    %42 = tpu.memref_slice %arg2[%c0_i32_26, %c0_i32_27] : memref<1024x128xf32, #tpu.memory_space<any>> -> memref<1x128xf32, #tpu.memory_space<any>>
    %c5_i32 = arith.constant 5 : i32
    %c0_i32_28 = arith.constant 0 : i32
    %43 = tpu.memref_slice %arg4[%9, %c5_i32, %c0_i32_28] : memref<2x8x128xf32, #tpu.memory_space<vmem>> -> memref<1x1x128xf32, #tpu.memory_space<vmem>>
    %44 = tpu.memref_squeeze %43 : memref<1x1x128xf32, #tpu.memory_space<vmem>> -> memref<1x128xf32, #tpu.memory_space<vmem>>
    %45 = tpu.memref_slice %arg5[%9] : memref<2x!tpu.dma_semaphore, #tpu.memory_space<semaphore_mem>> -> memref<1x!tpu.dma_semaphore, #tpu.memory_space<semaphore_mem>>
    %46 = tpu.memref_squeeze %45 : memref<1x!tpu.dma_semaphore, #tpu.memory_space<semaphore_mem>> -> memref<!tpu.dma_semaphore, #tpu.memory_space<semaphore_mem>>
    tpu.wait_dma2 semaphore(%46 : memref<!tpu.dma_semaphore, #tpu.memory_space<semaphore_mem>>) src(%42 : memref<1x128xf32, #tpu.memory_space<any>>) dst(%44 : memref<1x128xf32, #tpu.memory_space<vmem>>)
    %c0_i32_29 = arith.constant 0 : i32
    %c0_i32_30 = arith.constant 0 : i32
    %47 = tpu.memref_slice %arg2[%c0_i32_29, %c0_i32_30] : memref<1024x128xf32, #tpu.memory_space<any>> -> memref<1x128xf32, #tpu.memory_space<any>>
    %c6_i32 = arith.constant 6 : i32
    %c0_i32_31 = arith.constant 0 : i32
    %48 = tpu.memref_slice %arg4[%9, %c6_i32, %c0_i32_31] : memref<2x8x128xf32, #tpu.memory_space<vmem>> -> memref<1x1x128xf32, #tpu.memory_space<vmem>>
    %49 = tpu.memref_squeeze %48 : memref<1x1x128xf32, #tpu.memory_space<vmem>> -> memref<1x128xf32, #tpu.memory_space<vmem>>
    %50 = tpu.memref_slice %arg5[%9] : memref<2x!tpu.dma_semaphore, #tpu.memory_space<semaphore_mem>> -> memref<1x!tpu.dma_semaphore, #tpu.memory_space<semaphore_mem>>
    %51 = tpu.memref_squeeze %50 : memref<1x!tpu.dma_semaphore, #tpu.memory_space<semaphore_mem>> -> memref<!tpu.dma_semaphore, #tpu.memory_space<semaphore_mem>>
    tpu.wait_dma2 semaphore(%51 : memref<!tpu.dma_semaphore, #tpu.memory_space<semaphore_mem>>) src(%47 : memref<1x128xf32, #tpu.memory_space<any>>) dst(%49 : memref<1x128xf32, #tpu.memory_space<vmem>>)
    %c0_i32_32 = arith.constant 0 : i32
    %c0_i32_33 = arith.constant 0 : i32
    %52 = tpu.memref_slice %arg2[%c0_i32_32, %c0_i32_33] : memref<1024x128xf32, #tpu.memory_space<any>> -> memref<1x128xf32, #tpu.memory_space<any>>
    %c7_i32 = arith.constant 7 : i32
    %c0_i32_34 = arith.constant 0 : i32
    %53 = tpu.memref_slice %arg4[%9, %c7_i32, %c0_i32_34] : memref<2x8x128xf32, #tpu.memory_space<vmem>> -> memref<1x1x128xf32, #tpu.memory_space<vmem>>
    %54 = tpu.memref_squeeze %53 : memref<1x1x128xf32, #tpu.memory_space<vmem>> -> memref<1x128xf32, #tpu.memory_space<vmem>>
    %55 = tpu.memref_slice %arg5[%9] : memref<2x!tpu.dma_semaphore, #tpu.memory_space<semaphore_mem>> -> memref<1x!tpu.dma_semaphore, #tpu.memory_space<semaphore_mem>>
    %56 = tpu.memref_squeeze %55 : memref<1x!tpu.dma_semaphore, #tpu.memory_space<semaphore_mem>> -> memref<!tpu.dma_semaphore, #tpu.memory_space<semaphore_mem>>
    tpu.wait_dma2 semaphore(%56 : memref<!tpu.dma_semaphore, #tpu.memory_space<semaphore_mem>>) src(%52 : memref<1x128xf32, #tpu.memory_space<any>>) dst(%54 : memref<1x128xf32, #tpu.memory_space<vmem>>)
    %57 = arith.index_cast %9 : i32 to index
    %c0 = arith.constant 0 : index
    %c0_35 = arith.constant 0 : index
    %58 = vector.load %arg4[%57, %c0, %c0_35] : memref<2x8x128xf32, #tpu.memory_space<vmem>>, vector<1x8x128xf32>
    %59 = vector.shape_cast %58 : vector<1x8x128xf32> to vector<8x128xf32>
    %c0_36 = arith.constant 0 : index
    %c0_37 = arith.constant 0 : index
    %60 = vector.load %arg3[%c0_36, %c0_37] : memref<8x128xf32, #tpu.memory_space<vmem>>, vector<8x128xf32>
    tpu.vector_store %arg3[%c0_36, %c0_37], %59 {strides = array<i32>} : memref<8x128xf32, #tpu.memory_space<vmem>>, vector<8x128xf32>,
    return
  }
  func.func @transform_1(%arg0: i32, %arg1: memref<16xi32, #tpu.memory_space<smem>>) -> (i32, i32) {
    %c0_i32 = arith.constant 0 : i32
    %c0_i32_0 = arith.constant 0 : i32
    return %arg0, %c0_i32 : i32, i32
  }
}

</mosaic_0001>

<bundles_post_ra>
// kernel: tpu_custom_call.1
= control target key start
LH: loop header
LB: loop body
LE: loop exit
PB: predicated region body
PF: predicated region fallthrough
CT: control target
= control target key end

     0   :  { %s1117_s12 = smov [#allocation5]   ;;  %s1605_s0 = inlined_call_operand.hbm [shape: s32[16], index: 0, kind: input, shape index: {}]   ;;  %s1606_s1 = inlined_call_operand.hbm [shape: f32[1024,128], index: 1, kind: input, shape index: {}]   ;;  %s1607_s2 = inlined_call_operand.hbm [shape: f32[16,128], index: 2, kind: output, shape index: {}]  }
   0x1   :  { %s8_s11 = sshll.u32 %s1605_s0, 4  ;;  %s9_s11 = int_to_ptr.hbm [resolvable:$true] %s8_s11 }
   0x2   :  { %11 = dma.hbm_to_smem %s9_s11, 16, %s1117_s12, [#allocation4] }
   0x3   :  { %1097 = dma.done.wait [#allocation4], 16 }
   0x4   :  { %1098 = vsyncadd [#allocation4], 4294967280 }
   0x5   :  { %14 = sfence }
   0x6   :  { %15 = vsyncpa [#allocation7], 0 }
   0x7   :  { %17 = vsyncpa [#allocation7 + $0x1], 0  ;;  %s1144_s13 = smov 0   ;;  %s1146_s14 = smov 0  }
   0x8   :  { %s1148_s15 = smov 0  }
   0x9 LB: > { %s487_s0 = sadd.s32 4294967295, %s1115_s15   ;;  %s1161_s16 = sadd.s32 1, %s1115_s15   ;;  %s1115_s15 = sphi %s1148_s15, %s1618_s15   ;;  %s1111_s14 = sphi %s1146_s14, %s1617_s14   ;;  %s1107_s13 = sphi %s1144_s13, %s1616_s13  }
   0xa   : > { %s26_s17 = ssub.s32 %s1115_s15, %s1161_s16  ;;  %s29_s18 = sadd.s32 1, %s1111_s14 }
   0xb   : > { %p27_p0 = scmp.eq.s32.totalorder %s26_s17, 0  ;;  %p488_p1 = scmp.ne.s32.totalorder %s26_s17, 0 }
   0xc   : > { %p33_p2 = scmp.eq.s32.totalorder %s1115_s15, 1  ;;  %p38_p3 = scmp.ne.s32.totalorder %s1111_s14, %s1107_s13 }
   0xd   : > { %s1170_s19 = scalar_select %p27_p0, %s1111_s14, %s29_s18  }
   0xe   : > { %p1172_p4 = por %p488_p1, %p33_p2  ;;  %p39_p5 = scmp.eq.s32.totalorder %s487_s0, 1 }
   0xf   : > { %p489_p7 = scmp.ge.s32.totalorder %s1115_s15, 2 }
  0x10   : > { %p1176_p6 = por %p39_p5, %p38_p3  ;;  %s1608_s22 = sand.u32 (!%p489_p7), 1, %s1111_s14  }
  0x11   : > { %48 = sbr.rel (%p489_p7) target bundleno = 380 (0x17c), region = 12  ;;  %s1184_s23 = sshll.u32 (!%p489_p7), %s1608_s22, 3 }
  0x12   : > { %s1611_s21 = scalar_select %p1176_p6, 1, 0 }
  0x13   : > { %p561_p8 = scmp.eq.s32.totalorder (!%p489_p7), %s1115_s15, 0  ;;  %s72_s24 = sld [smem:[#allocation5]] (!%p489_p7) }
  0x14   : > { %s495_s25 = sld [smem:[#allocation5 + $0x1]] (!%p489_p7)  ;;  %s1118_s26 = smov (!%p489_p7), [#allocation2]  }
  0x15   : > { %s83_s27 = sshll.u32 (!%p489_p7), %s1118_s26, 4  ;;  %s1119_s28 = smov (!%p489_p7), [#allocation2 + $0x1]   ;;  %s84_s27 = int_to_ptr.vmem [resolvable:$true] %s83_s27 }
  0x16   : > { %s1188_s29 = sshll.u32 %s1119_s28, 4  ;;  %s1191_s30 = sld [smem:[#allocation5 + $0x2]]  ;;  %s100_s29 = int_to_ptr.vmem [resolvable:$true] %s1188_s29 }
  0x17   : > { %s1193_s3 = sld [smem:[#allocation5 + $0x3]]  ;;  %s1120_s7 = smov [#allocation2 + $0x2]  }
  0x18   : > { %s1198_s8 = sshll.u32 %s1120_s7, 4  ;;  %s116_s8 = int_to_ptr.vmem [resolvable:$true] %s1198_s8 }
  0x19   : > { %s73_s6 = scalar_lea.hbm %s1606_s1, %s72_s24  ;;  %s1208_s24 = scalar_lea.hbm %s1606_s1, 1024 }
  0x1a   : > { %s81_s9 = sshll.u32 %s73_s6, 4  ;;  %s88_s12 = scalar_lea.hbm %s1606_s1, %s495_s25  ;;  %s82_s9 = int_to_ptr.hbm [resolvable:$true] %s81_s9 }
  0x1b   : > { %s97_s0 = sshll.u32 %s88_s12, 4  ;;  %s609_s17 = sshra.s32 %s82_s9, 4  ;;  %s610_s17 = int_to_ptr.hbm [resolvable:$true] %s609_s17  ;;  %s98_s0 = int_to_ptr.hbm [resolvable:$true] %s97_s0 }
  0x1c   : > { %s611_s18 = scalar_lea.hbm %s610_s17, 1  ;;  %p616_p12 = scmp.lt.s32.totalorder %s610_s17, %s1606_s1 }
  0x1d   : > { %p612_p9 = scmp.ne.s32.totalorder %s610_s17, %s611_s18  ;;  %p617_p13 = scmp.lt.s32.totalorder %s1208_s24, %s611_s18 }
  0x1f   : > { %p613_p10 = pnand %p612_p9, %p561_p8  ;;  %p618_p0 = por %p617_p13, %p616_p12 }
  0x21   : > { %p614_p11 = pneg %p613_p10 }
  0x23   : > { %p619_p1 = pnand %p618_p0, %p614_p11 }
  0x25   : > { %622 = shalt.err (!%p619_p1)  }
  0x26   : > { %522 = dma.hbm_to_vmem [thread:$0]  (%p561_p8), %s82_s9, 16, %s84_s27, [#allocation3] }
  0x27   : > { %s104_s10 = scalar_lea.hbm %s1606_s1, %s1191_s30  ;;  %s637_s11 = sshra.s32 %s98_s0, 4  ;;  %s638_s11 = int_to_ptr.hbm [resolvable:$true] %s637_s11 }
  0x28   : > { %s639_s12 = scalar_lea.hbm %s638_s11, 1  ;;  %p644_p7 = scmp.lt.s32.totalorder %s638_s11, %s1606_s1 }
  0x29   : > { %p640_p2 = scmp.ne.s32.totalorder %s638_s11, %s639_s12  ;;  %p645_p9 = scmp.lt.s32.totalorder %s1208_s24, %s639_s12 }
  0x2b   : > { %p641_p3 = pnand %p640_p2, %p561_p8  ;;  %p646_p10 = por %p645_p9, %p644_p7 }
  0x2d   : > { %p642_p5 = pneg %p641_p3 }
  0x2f   : > { %p647_p11 = pnand %p646_p10, %p642_p5 }
  0x31   : > { %650 = shalt.err (!%p647_p11)  }
  0x32   : > { %523 = dma.hbm_to_vmem [thread:$0]  (%p561_p8), %s98_s0, 16, %s100_s29, [#allocation3] }
  0x33   : > { %s113_s27 = sshll.u32 %s104_s10, 4  ;;  %s120_s28 = scalar_lea.hbm %s1606_s1, %s1193_s3  ;;  %s114_s27 = int_to_ptr.hbm [resolvable:$true] %s113_s27 }
  0x34   : > { %s665_s4 = sshra.s32 %s114_s27, 4  ;;  %s666_s4 = int_to_ptr.hbm [resolvable:$true] %s665_s4 }
  0x35   : > { %s667_s5 = scalar_lea.hbm %s666_s4, 1  ;;  %p672_p1 = scmp.lt.s32.totalorder %s666_s4, %s1606_s1 }
  0x36   : > { %p668_p12 = scmp.ne.s32.totalorder %s666_s4, %s667_s5  ;;  %p673_p2 = scmp.lt.s32.totalorder %s1208_s24, %s667_s5 }
  0x38   : > { %p669_p13 = pnand %p668_p12, %p561_p8  ;;  %p674_p3 = por %p673_p2, %p672_p1 }
  0x3a   : > { %p670_p0 = pneg %p669_p13 }
  0x3c   : > { %p675_p5 = pnand %p674_p3, %p670_p0 }
  0x3e   : > { %678 = shalt.err (!%p675_p5)  }
  0x3f   : > { %524 = dma.hbm_to_vmem [thread:$0]  (%p561_p8), %s114_s27, 16, %s116_s8, [#allocation3] }
  0x40   : > { %s129_s29 = sshll.u32 %s120_s28, 4  ;;  %s1121_s3 = smov [#allocation2 + $0x3]   ;;  %s130_s29 = int_to_ptr.hbm [resolvable:$true] %s129_s29 }
  0x41   : > { %s131_s0 = sshll.u32 %s1121_s3, 4  ;;  %s498_s7 = sld [smem:[#allocation5 + $0x4]]  ;;  %s132_s0 = int_to_ptr.vmem [resolvable:$true] %s131_s0 }
  0x42   : > { %s693_s10 = sshra.s32 %s130_s29, 4  ;;  %s694_s10 = int_to_ptr.hbm [resolvable:$true] %s693_s10 }
  0x43   : > { %s695_s11 = scalar_lea.hbm %s694_s10, 1  ;;  %p700_p11 = scmp.lt.s32.totalorder %s694_s10, %s1606_s1 }
  0x44   : > { %p696_p7 = scmp.ne.s32.totalorder %s694_s10, %s695_s11  ;;  %p701_p12 = scmp.lt.s32.totalorder %s1208_s24, %s695_s11 }
  0x46   : > { %p697_p9 = pnand %p696_p7, %p561_p8  ;;  %p702_p13 = por %p701_p12, %p700_p11 }
  0x48   : > { %p698_p10 = pneg %p697_p9 }
  0x4a   : > { %p703_p0 = pnand %p702_p13, %p698_p10 }
  0x4c   : > { %706 = shalt.err (!%p703_p0)  }
  0x4d   : > { %525 = dma.hbm_to_vmem [thread:$0]  (%p561_p8), %s130_s29, 16, %s132_s0, [#allocation3] }
  0x4e   : > { %s499_s8 = sld [smem:[#allocation5 + $0x5]]  ;;  %s1122_s18 = smov [#allocation2 + $0x4]  }
  0x4f   : > { %s147_s27 = sshll.u32 %s1122_s18, 4  ;;  %s1123_s30 = smov [#allocation2 + $0x5]   ;;  %s148_s27 = int_to_ptr.vmem [resolvable:$true] %s147_s27 }
  0x50   : > { %s1251_s9 = sshll.u32 %s1123_s30, 4  ;;  %s1254_s28 = sld [smem:[#allocation5 + $0x6]]  ;;  %s164_s9 = int_to_ptr.vmem [resolvable:$true] %s1251_s9 }
  0x51   : > { %s136_s6 = scalar_lea.hbm %s1606_s1, %s498_s7  ;;  %s1124_s3 = smov [#allocation2 + $0x6]  }
  0x52   : > { %s145_s25 = sshll.u32 %s136_s6, 4  ;;  %s1259_s29 = sshll.u32 %s1124_s3, 4  ;;  %s146_s25 = int_to_ptr.hbm [resolvable:$true] %s145_s25  ;;  %s180_s29 = int_to_ptr.vmem [resolvable:$true] %s1259_s29 }
  0x53   : > { %s721_s12 = sshra.s32 %s146_s25, 4  ;;  %s722_s12 = int_to_ptr.hbm [resolvable:$true] %s721_s12 }
  0x54   : > { %s152_s11 = scalar_lea.hbm %s1606_s1, %s499_s8  ;;  %s723_s17 = scalar_lea.hbm %s722_s12, 1 }
  0x55   : > { %p724_p1 = scmp.ne.s32.totalorder %s722_s12, %s723_s17  ;;  %p728_p5 = scmp.lt.s32.totalorder %s722_s12, %s1606_s1 }
  0x56   : > { %p729_p7 = scmp.lt.s32.totalorder %s1208_s24, %s723_s17 }
  0x57   : > { %p725_p2 = pnand %p724_p1, %p561_p8 }
  0x58   : > { %p730_p9 = por %p729_p7, %p728_p5 }
  0x59   : > { %p726_p3 = pneg %p725_p2 }
  0x5b   : > { %p731_p10 = pnand %p730_p9, %p726_p3 }
  0x5d   : > { %734 = shalt.err (!%p731_p10)  }
  0x5e   : > { %526 = dma.hbm_to_vmem [thread:$0]  (%p561_p8), %s146_s25, 16, %s148_s27, [#allocation3] }
  0x5f   : > { %s161_s7 = sshll.u32 %s152_s11, 4  ;;  %s168_s5 = scalar_lea.hbm %s1606_s1, %s1254_s28  ;;  %s162_s7 = int_to_ptr.hbm [resolvable:$true] %s161_s7 }
  0x60   : > { %s749_s6 = sshra.s32 %s162_s7, 4  ;;  %s750_s6 = int_to_ptr.hbm [resolvable:$true] %s749_s6 }
  0x61   : > { %s751_s3 = scalar_lea.hbm %s750_s6, 1  ;;  %p756_p0 = scmp.lt.s32.totalorder %s750_s6, %s1606_s1 }
  0x62   : > { %p752_p11 = scmp.ne.s32.totalorder %s750_s6, %s751_s3  ;;  %p757_p1 = scmp.lt.s32.totalorder %s1208_s24, %s751_s3 }
  0x64   : > { %p753_p12 = pnand %p752_p11, %p561_p8  ;;  %p758_p2 = por %p757_p1, %p756_p0 }
  0x66   : > { %p754_p13 = pneg %p753_p12 }
  0x68   : > { %p759_p3 = pnand %p758_p2, %p754_p13 }
  0x6a   : > { %762 = shalt.err (!%p759_p3)  }
  0x6b   : > { %527 = dma.hbm_to_vmem [thread:$0]  (%p561_p8), %s162_s7, 16, %s164_s9, [#allocation3] }
  0x6c   : > { %s177_s27 = sshll.u32 %s168_s5, 4  ;;  %s501_s28 = sld [smem:[#allocation5 + $0x7]]  ;;  %s178_s27 = int_to_ptr.hbm [resolvable:$true] %s177_s27 }
  0x6d   : > { %s777_s25 = sshra.s32 %s178_s27, 4  ;;  %s778_s25 = int_to_ptr.hbm [resolvable:$true] %s777_s25 }
  0x6e   : > { %s779_s11 = scalar_lea.hbm %s778_s25, 1  ;;  %p784_p10 = scmp.lt.s32.totalorder %s778_s25, %s1606_s1 }
  0x6f   : > { %p780_p5 = scmp.ne.s32.totalorder %s778_s25, %s779_s11  ;;  %p785_p11 = scmp.lt.s32.totalorder %s1208_s24, %s779_s11 }
  0x71   : > { %p781_p7 = pnand %p780_p5, %p561_p8  ;;  %p786_p12 = por %p785_p11, %p784_p10 }
  0x73   : > { %p782_p9 = pneg %p781_p7 }
  0x75   : > { %p787_p13 = pnand %p786_p12, %p782_p9 }
  0x77   : > { %790 = shalt.err (!%p787_p13)  }
  0x78   : > { %528 = dma.hbm_to_vmem [thread:$0]  (%p561_p8), %s178_s27, 16, %s180_s29, [#allocation3] }
  0x79   : > { %s1125_s9 = smov [#allocation2 + $0x7]   ;;  %p56_p0 = scmp.lt.s32.totalorder %s1115_s15, 0 }
  0x7a   : > { %s195_s18 = sshll.u32 %s1125_s9, 4  ;;  %s57_s30 = ssub.s32 0, %s1115_s15  ;;  %s196_s18 = int_to_ptr.vmem [resolvable:$true] %s195_s18 }
  0x7b   : > { %s491_s7 = smin.u32 %s1115_s15, %s57_s30  ;;  %s184_s5 = scalar_lea.hbm %s1606_s1, %s501_s28 }
  0x7c   : > { %s59_s6 = sand.u32 1, %s491_s7   ;;  %s193_s3 = sshll.u32 %s184_s5, 4  ;;  %s194_s3 = int_to_ptr.hbm [resolvable:$true] %s193_s3 }
  0x7d   : > { %s60_s0 = ssub.s32 0, %s59_s6  ;;  %s805_s10 = sshra.s32 %s194_s3, 4  ;;  %s806_s10 = int_to_ptr.hbm [resolvable:$true] %s805_s10 }
  0x7e   : > { %s807_s25 = scalar_lea.hbm %s806_s10, 1  ;;  %p812_p5 = scmp.lt.s32.totalorder %s806_s10, %s1606_s1 }
  0x7f   : > { %p808_p1 = scmp.ne.s32.totalorder %s806_s10, %s807_s25  ;;  %p813_p7 = scmp.lt.s32.totalorder %s1208_s24, %s807_s25 }
  0x81   : > { %p809_p2 = pnand %p808_p1, %p561_p8  ;;  %p814_p9 = por %p813_p7, %p812_p5 }
  0x83   : > { %p810_p3 = pneg %p809_p2 }
  0x85   : > { %p815_p10 = pnand %p814_p9, %p810_p3 }
  0x87   : > { %818 = shalt.err (!%p815_p10)  }
  0x88   : > { %529 = dma.hbm_to_vmem [thread:$0]  (%p561_p8), %s194_s3, 16, %s196_s18, [#allocation3] }
  0x89   : > { %s1620_s0 = smov (!%p56_p0, %s60_s0), %s59_s6  ;;  %p562_p11 = scmp.lt.s32.totalorder %s1161_s16, 2 }
  0x8a   : > { %s1609_s28 = sshll.u32 %s1115_s15, 3  ;;  %p493_p12 = scmp.lt.s32.totalorder %s1620_s0, 0 }
  0x8b   : > { %s66_s11 = sadd.s32 2, %s1620_s0  ;;  %s1317_s12 = sadd.s32 8, %s1609_s28 }
  0x8c   : > { %s1622_s11 = smov (!%p493_p12, %s66_s11), %s1620_s0  ;;  %s224_s5 = sadd.s32 1, %s1317_s12 }
  0x8d   : > { %s531_s17 = scalar_select %p562_p11, [#allocation5], [#allocation42] }
  0x8e   : > { %s204_s9 = ssub.s32 1, %s1622_s11  ;;  %s1624_s5 = smov (!%p562_p11, %s224_s5), 0 }
  0x8f   : > { %s532_s18 = scalar_select %p562_p11, %s1317_s12, 0 }
  0x90   : > { %s504_s30 = sshll.u32 %s204_s9, 3  ;;  %s1351_s22 = scalar_lea.sflag [#allocation3], %s204_s9 }
  0x91   : > { %s206_s7 = sld [smem:[%s531_s17 + %s532_s18]]  ;;  %s1327_s8 = scalar_lea.vmem [#allocation2], %s504_s30 }
  0x92   : > { %s220_s4 = sshll.u32 %s1327_s8, 4  ;;  %s440_s6 = scalar_lea.vmem %s1327_s8, 1 [#allocation2]  ;;  %s1331_s4 = int_to_ptr.vmem [resolvable:$true] %s220_s4 }
  0x93   : > { %s534_s3 = scalar_select %p562_p11, [#allocation5], [#allocation43] }
  0x94   : > { %s1338_s0 = sshll.u32 %s440_s6, 4  ;;  %s444_s30 = scalar_lea.vmem %s1327_s8, 2 [#allocation2]  ;;  %s239_s0 = int_to_ptr.vmem [resolvable:$true] %s1338_s0 }
  0x95   : > { %s1344_s17 = sld [smem:[%s534_s3 + %s1624_s5]] }
  0x97   : > { %s207_s27 = scalar_lea.hbm %s1606_s1, %s206_s7 }
  0x98   : > { %s1346_s18 = sshll.u32 %s207_s27, 4  ;;  %s219_s18 = int_to_ptr.hbm [resolvable:$true] %s1346_s18 }
  0x99   : > { %s833_s28 = sshra.s32 %s219_s18, 4  ;;  %s834_s28 = int_to_ptr.hbm [resolvable:$true] %s833_s28 }
  0x9a   : > { %s835_s6 = scalar_lea.hbm %s834_s28, 1  ;;  %p840_p1 = scmp.lt.s32.totalorder %s834_s28, %s1606_s1 }
  0x9b   : > { %p836_p8 = scmp.ne.s32.totalorder %s834_s28, %s835_s6  ;;  %p841_p2 = scmp.lt.s32.totalorder %s1208_s24, %s835_s6 }
  0x9d   : > { %p837_p13 = pnand %p836_p8, %p562_p11  ;;  %p842_p3 = por %p841_p2, %p840_p1 }
  0x9f   : > { %p838_p0 = pneg %p837_p13 }
  0xa1   : > { %p843_p5 = pnand %p842_p3, %p838_p0 }
  0xa3   : > { %846 = shalt.err (!%p843_p5)  }
  0xa4   : > { %s847_s7 = sshra.s32 %s1331_s4, 4  ;;  %s1363_s5 = scalar_lea.vmem %s1118_s26, 16  ;;  %s848_s7 = int_to_ptr.vmem [resolvable:$true] %s847_s7 }
  0xa5   : > { %s849_s9 = scalar_lea.vmem %s848_s7, 1  ;;  %p854_p12 = scmp.lt.s32.totalorder %s848_s7, [#allocation2] }
  0xa6   : > { %p850_p7 = scmp.ne.s32.totalorder %s848_s7, %s849_s9  ;;  %p855_p8 = scmp.lt.s32.totalorder %s1363_s5, %s849_s9 }
  0xa8   : > { %p851_p9 = pnand %p850_p7, %p562_p11  ;;  %p856_p13 = por %p855_p8, %p854_p12 }
  0xaa   : > { %p852_p10 = pneg %p851_p9 }
  0xac   : > { %p857_p6 = pnand %p856_p13, %p852_p10 }
  0xae   : > { %860 = shalt.err (!%p857_p6)  }
  0xaf   : > { %533 = dma.hbm_to_vmem [thread:$0]  (%p562_p11), %s219_s18, 16, %s1331_s4, %s1351_s22 }
  0xb0   : > { %s537_s26 = scalar_select %p562_p11, [#allocation5], [#allocation44] }
  0xb1   : > { %s1612_s28 = sadd.s32 2, %s1317_s12  ;;  %s226_s29 = scalar_lea.hbm %s1606_s1, %s1344_s17 }
  0xb2   : > { %s1626_s28 = smov (!%p562_p11, %s1612_s28), 0  ;;  %s1382_s27 = sshll.u32 %s444_s30, 4  ;;  %s257_s27 = int_to_ptr.vmem [resolvable:$true] %s1382_s27 }
  0xb3   : > { %s236_s6 = sshll.u32 %s226_s29, 4  ;;  %s1384_s25 = sld [smem:[%s537_s26 + %s1626_s28]]  ;;  %s237_s6 = int_to_ptr.hbm [resolvable:$true] %s236_s6 }
  0xb4   : > { %s861_s4 = sshra.s32 %s237_s6, 4  ;;  %s862_s4 = int_to_ptr.hbm [resolvable:$true] %s861_s4 }
  0xb5   : > { %s863_s18 = scalar_lea.hbm %s862_s4, 1  ;;  %p868_p2 = scmp.lt.s32.totalorder %s862_s4, %s1606_s1 }
  0xb6   : > { %p864_p6 = scmp.ne.s32.totalorder %s862_s4, %s863_s18  ;;  %p869_p3 = scmp.lt.s32.totalorder %s1208_s24, %s863_s18 }
  0xb8   : > { %p865_p0 = pnand %p864_p6, %p562_p11  ;;  %p870_p5 = por %p869_p3, %p868_p2 }
  0xba   : > { %p866_p1 = pneg %p865_p0 }
  0xbc   : > { %p871_p7 = pnand %p870_p5, %p866_p1 }
  0xbe   : > { %874 = shalt.err (!%p871_p7)  }
  0xbf   : > { %s875_s17 = sshra.s32 %s239_s0, 4  ;;  %s876_s17 = int_to_ptr.vmem [resolvable:$true] %s875_s17 }
  0xc0   : > { %s877_s30 = scalar_lea.vmem %s876_s17, 1  ;;  %p882_p8 = scmp.lt.s32.totalorder %s876_s17, [#allocation2] }
  0xc1   : > { %p878_p9 = scmp.ne.s32.totalorder %s876_s17, %s877_s30  ;;  %p883_p13 = scmp.lt.s32.totalorder %s1363_s5, %s877_s30 }
  0xc3   : > { %p879_p10 = pnand %p878_p9, %p562_p11  ;;  %p884_p6 = por %p883_p13, %p882_p8 }
  0xc5   : > { %p880_p12 = pneg %p879_p10 }
  0xc7   : > { %p885_p0 = pnand %p884_p6, %p880_p12 }
  0xc9   : > { %888 = shalt.err (!%p885_p0)  }
  0xca   : > { %536 = dma.hbm_to_vmem [thread:$0]  (%p562_p11), %s237_s6, 16, %s239_s0, %s1351_s22 }
  0xcb   : > { %s260_s26 = sadd.s32 3, %s1317_s12  ;;  %s448_s28 = scalar_lea.vmem %s1327_s8, 3 [#allocation2] }
  0xcc   : > { %s540_s3 = scalar_select %p562_p11, [#allocation5], [#allocation45] }
  0xcd   : > { %s1628_s26 = smov (!%p562_p11, %s260_s26), 0  ;;  %s244_s4 = scalar_lea.hbm %s1606_s1, %s1384_s25 }
  0xce   : > { %s1413_s18 = sshll.u32 %s448_s28, 4  ;;  %s254_s7 = sshll.u32 %s244_s4, 4  ;;  %s255_s7 = int_to_ptr.hbm [resolvable:$true] %s254_s7  ;;  %s275_s18 = int_to_ptr.vmem [resolvable:$true] %s1413_s18 }
  0xcf   : > { %s1415_s9 = sld [smem:[%s540_s3 + %s1628_s26]]  ;;  %s889_s0 = sshra.s32 %s255_s7, 4  ;;  %s890_s0 = int_to_ptr.hbm [resolvable:$true] %s889_s0 }
  0xd0   : > { %s891_s6 = scalar_lea.hbm %s890_s0, 1  ;;  %p896_p5 = scmp.lt.s32.totalorder %s890_s0, %s1606_s1 }
  0xd1   : > { %p892_p1 = scmp.ne.s32.totalorder %s890_s0, %s891_s6  ;;  %p897_p7 = scmp.lt.s32.totalorder %s1208_s24, %s891_s6 }
  0xd3   : > { %p893_p2 = pnand %p892_p1, %p562_p11  ;;  %p898_p9 = por %p897_p7, %p896_p5 }
  0xd5   : > { %p894_p3 = pneg %p893_p2 }
  0xd7   : > { %p899_p10 = pnand %p898_p9, %p894_p3 }
  0xd9   : > { %902 = shalt.err (!%p899_p10)  }
  0xda   : > { %s903_s25 = sshra.s32 %s257_s27, 4  ;;  %s904_s25 = int_to_ptr.vmem [resolvable:$true] %s903_s25 }
  0xdb   : > { %s905_s26 = scalar_lea.vmem %s904_s25, 1  ;;  %p910_p6 = scmp.lt.s32.totalorder %s904_s25, [#allocation2] }
  0xdc   : > { %p906_p12 = scmp.ne.s32.totalorder %s904_s25, %s905_s26  ;;  %p911_p0 = scmp.lt.s32.totalorder %s1363_s5, %s905_s26 }
  0xde   : > { %p907_p8 = pnand %p906_p12, %p562_p11  ;;  %p912_p1 = por %p911_p0, %p910_p6 }
  0xe0   : > { %p908_p13 = pneg %p907_p8 }
  0xe2   : > { %p913_p2 = pnand %p912_p1, %p908_p13 }
  0xe4   : > { %916 = shalt.err (!%p913_p2)  }
  0xe5   : > { %539 = dma.hbm_to_vmem [thread:$0]  (%p562_p11), %s255_s7, 16, %s257_s27, %s1351_s22 }
  0xe6   : > { %s278_s28 = sadd.s32 4, %s1317_s12  ;;  %s452_s3 = scalar_lea.vmem %s1327_s8, 4 [#allocation2] }
  0xe7   : > { %s543_s10 = scalar_select %p562_p11, [#allocation5], [#allocation46] }
  0xe8   : > { %s1630_s28 = smov (!%p562_p11, %s278_s28), 0  ;;  %s262_s0 = scalar_lea.hbm %s1606_s1, %s1415_s9 }
  0xe9   : > { %s1444_s6 = sshll.u32 %s452_s3, 4  ;;  %s272_s17 = sshll.u32 %s262_s0, 4  ;;  %s273_s17 = int_to_ptr.hbm [resolvable:$true] %s272_s17  ;;  %s293_s6 = int_to_ptr.vmem [resolvable:$true] %s1444_s6 }
  0xea   : > { %s1446_s30 = sld [smem:[%s543_s10 + %s1630_s28]]  ;;  %s917_s27 = sshra.s32 %s273_s17, 4  ;;  %s918_s27 = int_to_ptr.hbm [resolvable:$true] %s917_s27 }
  0xeb   : > { %s919_s7 = scalar_lea.hbm %s918_s27, 1  ;;  %p924_p9 = scmp.lt.s32.totalorder %s918_s27, %s1606_s1 }
  0xec   : > { %p920_p3 = scmp.ne.s32.totalorder %s918_s27, %s919_s7  ;;  %p925_p10 = scmp.lt.s32.totalorder %s1208_s24, %s919_s7 }
  0xee   : > { %p921_p5 = pnand %p920_p3, %p562_p11  ;;  %p926_p12 = por %p925_p10, %p924_p9 }
  0xf0   : > { %p922_p7 = pneg %p921_p5 }
  0xf2   : > { %p927_p8 = pnand %p926_p12, %p922_p7 }
  0xf4   : > { %930 = shalt.err (!%p927_p8)  }
  0xf5   : > { %s931_s9 = sshra.s32 %s275_s18, 4  ;;  %s932_s9 = int_to_ptr.vmem [resolvable:$true] %s931_s9 }
  0xf6   : > { %s933_s28 = scalar_lea.vmem %s932_s9, 1  ;;  %p938_p1 = scmp.lt.s32.totalorder %s932_s9, [#allocation2] }
  0xf7   : > { %p934_p13 = scmp.ne.s32.totalorder %s932_s9, %s933_s28  ;;  %p939_p2 = scmp.lt.s32.totalorder %s1363_s5, %s933_s28 }
  0xf9   : > { %p935_p6 = pnand %p934_p13, %p562_p11  ;;  %p940_p3 = por %p939_p2, %p938_p1 }
  0xfb   : > { %p936_p0 = pneg %p935_p6 }
  0xfd   : > { %p941_p5 = pnand %p940_p3, %p936_p0 }
  0xff   : > { %944 = shalt.err (!%p941_p5)  }
 0x100   : > { %542 = dma.hbm_to_vmem [thread:$0]  (%p562_p11), %s273_s17, 16, %s275_s18, %s1351_s22 }
 0x101   : > { %s296_s3 = sadd.s32 5, %s1317_s12  ;;  %s456_s10 = scalar_lea.vmem %s1327_s8, 5 [#allocation2] }
 0x102   : > { %s546_s29 = scalar_select %p562_p11, [#allocation5], [#allocation47] }
 0x103   : > { %s1632_s3 = smov (!%p562_p11, %s296_s3), 0  ;;  %s280_s27 = scalar_lea.hbm %s1606_s1, %s1446_s30 }
 0x104   : > { %s1475_s7 = sshll.u32 %s456_s10, 4  ;;  %s290_s25 = sshll.u32 %s280_s27, 4  ;;  %s291_s25 = int_to_ptr.hbm [resolvable:$true] %s290_s25  ;;  %s311_s7 = int_to_ptr.vmem [resolvable:$true] %s1475_s7 }
 0x105   : > { %s1477_s26 = sld [smem:[%s546_s29 + %s1632_s3]]  ;;  %s945_s18 = sshra.s32 %s291_s25, 4  ;;  %s946_s18 = int_to_ptr.hbm [resolvable:$true] %s945_s18 }
 0x106   : > { %s947_s17 = scalar_lea.hbm %s946_s18, 1  ;;  %p952_p12 = scmp.lt.s32.totalorder %s946_s18, %s1606_s1 }
 0x107   : > { %p948_p7 = scmp.ne.s32.totalorder %s946_s18, %s947_s17  ;;  %p953_p8 = scmp.lt.s32.totalorder %s1208_s24, %s947_s17 }
 0x109   : > { %p949_p9 = pnand %p948_p7, %p562_p11  ;;  %p954_p13 = por %p953_p8, %p952_p12 }
 0x10b   : > { %p950_p10 = pneg %p949_p9 }
 0x10d   : > { %p955_p6 = pnand %p954_p13, %p950_p10 }
 0x10f   : > { %958 = shalt.err (!%p955_p6)  }
 0x110   : > { %s959_s30 = sshra.s32 %s293_s6, 4  ;;  %s960_s30 = int_to_ptr.vmem [resolvable:$true] %s959_s30 }
 0x111   : > { %s961_s3 = scalar_lea.vmem %s960_s30, 1  ;;  %p966_p3 = scmp.lt.s32.totalorder %s960_s30, [#allocation2] }
 0x112   : > { %p962_p0 = scmp.ne.s32.totalorder %s960_s30, %s961_s3  ;;  %p967_p5 = scmp.lt.s32.totalorder %s1363_s5, %s961_s3 }
 0x114   : > { %p963_p1 = pnand %p962_p0, %p562_p11  ;;  %p968_p7 = por %p967_p5, %p966_p3 }
 0x116   : > { %p964_p2 = pneg %p963_p1 }
 0x118   : > { %p969_p9 = pnand %p968_p7, %p964_p2 }
 0x11a   : > { %972 = shalt.err (!%p969_p9)  }
 0x11b   : > { %545 = dma.hbm_to_vmem [thread:$0]  (%p562_p11), %s291_s25, 16, %s293_s6, %s1351_s22 }
 0x11c   : > { %s314_s10 = sadd.s32 6, %s1317_s12  ;;  %s460_s29 = scalar_lea.vmem %s1327_s8, 6 [#allocation2] }
 0x11d   : > { %s549_s4 = scalar_select %p562_p11, [#allocation5], [#allocation48] }
 0x11e   : > { %s1634_s10 = smov (!%p562_p11, %s314_s10), 0  ;;  %s298_s18 = scalar_lea.hbm %s1606_s1, %s1477_s26 }
 0x11f   : > { %s1506_s17 = sshll.u32 %s460_s29, 4  ;;  %s308_s9 = sshll.u32 %s298_s18, 4  ;;  %s309_s9 = int_to_ptr.hbm [resolvable:$true] %s308_s9  ;;  %s329_s17 = int_to_ptr.vmem [resolvable:$true] %s1506_s17 }
 0x120   : > { %s1508_s28 = sld [smem:[%s549_s4 + %s1634_s10]]  ;;  %s973_s30 = sshra.s32 %s309_s9, 4  ;;  %s974_s30 = int_to_ptr.hbm [resolvable:$true] %s973_s30 }
 0x121   : > { %s975_s6 = scalar_lea.hbm %s974_s30, 1  ;;  %p980_p13 = scmp.lt.s32.totalorder %s974_s30, %s1606_s1 }
 0x122   : > { %p976_p10 = scmp.ne.s32.totalorder %s974_s30, %s975_s6  ;;  %p981_p6 = scmp.lt.s32.totalorder %s1208_s24, %s975_s6 }
 0x124   : > { %p977_p12 = pnand %p976_p10, %p562_p11  ;;  %p982_p0 = por %p981_p6, %p980_p13 }
 0x126   : > { %p978_p8 = pneg %p977_p12 }
 0x128   : > { %p983_p1 = pnand %p982_p0, %p978_p8 }
 0x12a   : > { %986 = shalt.err (!%p983_p1)  }
 0x12b   : > { %s987_s26 = sshra.s32 %s311_s7, 4  ;;  %s988_s26 = int_to_ptr.vmem [resolvable:$true] %s987_s26 }
 0x12c   : > { %s989_s10 = scalar_lea.vmem %s988_s26, 1  ;;  %p994_p7 = scmp.lt.s32.totalorder %s988_s26, [#allocation2] }
 0x12d   : > { %p990_p2 = scmp.ne.s32.totalorder %s988_s26, %s989_s10  ;;  %p995_p9 = scmp.lt.s32.totalorder %s1363_s5, %s989_s10 }
 0x12f   : > { %p991_p3 = pnand %p990_p2, %p562_p11  ;;  %p996_p10 = por %p995_p9, %p994_p7 }
 0x131   : > { %p992_p5 = pneg %p991_p3 }
 0x133   : > { %p997_p12 = pnand %p996_p10, %p992_p5 }
 0x135   : > { %1000 = shalt.err (!%p997_p12)  }
 0x136   : > { %548 = dma.hbm_to_vmem [thread:$0]  (%p562_p11), %s309_s9, 16, %s311_s7, %s1351_s22 }
 0x137   : > { %s332_s29 = sadd.s32 7, %s1317_s12  ;;  %s316_s18 = scalar_lea.hbm %s1606_s1, %s1508_s28 }
 0x138   : > { %s552_s4 = scalar_select %p562_p11, [#allocation5], [#allocation49] }
 0x139   : > { %s1636_s29 = smov (!%p562_p11, %s332_s29), 0  ;;  %s464_s30 = scalar_lea.vmem %s1327_s8, 7 [#allocation2] }
 0x13a   : > { %s326_s6 = sshll.u32 %s316_s18, 4  ;;  %s333_s25 = sld [smem:[%s552_s4 + %s1636_s29]]  ;;  %s327_s6 = int_to_ptr.hbm [resolvable:$true] %s326_s6 }
 0x13b   : > { %s1001_s3 = sshra.s32 %s327_s6, 4  ;;  %s1002_s3 = int_to_ptr.hbm [resolvable:$true] %s1001_s3 }
 0x13c   : > { %s1003_s26 = scalar_lea.hbm %s1002_s3, 1  ;;  %p1008_p0 = scmp.lt.s32.totalorder %s1002_s3, %s1606_s1 }
 0x13d   : > { %p1004_p8 = scmp.ne.s32.totalorder %s1002_s3, %s1003_s26  ;;  %p1009_p1 = scmp.lt.s32.totalorder %s1208_s24, %s1003_s26 }
 0x13f   : > { %p1005_p13 = pnand %p1004_p8, %p562_p11  ;;  %p1010_p2 = por %p1009_p1, %p1008_p0 }
 0x141   : > { %p1006_p6 = pneg %p1005_p13 }
 0x143   : > { %p1011_p3 = pnand %p1010_p2, %p1006_p6 }
 0x145   : > { %1014 = shalt.err (!%p1011_p3)  }
 0x146   : > { %s1015_s8 = sshra.s32 %s329_s17, 4  ;;  %s1016_s8 = int_to_ptr.vmem [resolvable:$true] %s1015_s8 }
 0x147   : > { %s1017_s9 = scalar_lea.vmem %s1016_s8, 1  ;;  %p1022_p10 = scmp.lt.s32.totalorder %s1016_s8, [#allocation2] }
 0x148   : > { %p1018_p5 = scmp.ne.s32.totalorder %s1016_s8, %s1017_s9  ;;  %p1023_p12 = scmp.lt.s32.totalorder %s1363_s5, %s1017_s9 }
 0x14a   : > { %p1019_p7 = pnand %p1018_p5, %p562_p11  ;;  %p1024_p8 = por %p1023_p12, %p1022_p10 }
 0x14c   : > { %p1020_p9 = pneg %p1019_p7 }
 0x14e   : > { %p1025_p13 = pnand %p1024_p8, %p1020_p9 }
 0x150   : > { %1028 = shalt.err (!%p1025_p13)  }
 0x151   : > { %551 = dma.hbm_to_vmem [thread:$0]  (%p562_p11), %s327_s6, 16, %s329_s17, %s1351_s22 }
 0x152   : > { %s1553_s28 = sshll.u32 %s464_s30, 4  ;;  %s334_s4 = scalar_lea.hbm %s1606_s1, %s333_s25  ;;  %s347_s28 = int_to_ptr.vmem [resolvable:$true] %s1553_s28 }
 0x153   : > { %s344_s0 = sshll.u32 %s334_s4, 4  ;;  %s345_s0 = int_to_ptr.hbm [resolvable:$true] %s344_s0 }
 0x154   : > { %s1029_s27 = sshra.s32 %s345_s0, 4  ;;  %s1030_s27 = int_to_ptr.hbm [resolvable:$true] %s1029_s27 }
 0x155   : > { %s1031_s18 = scalar_lea.hbm %s1030_s27, 1  ;;  %p1036_p2 = scmp.lt.s32.totalorder %s1030_s27, %s1606_s1 }
 0x156   : > { %p1032_p6 = scmp.ne.s32.totalorder %s1030_s27, %s1031_s18  ;;  %p1037_p3 = scmp.lt.s32.totalorder %s1208_s24, %s1031_s18 }
 0x158   : > { %p1033_p0 = pnand %p1032_p6, %p562_p11  ;;  %p1038_p5 = por %p1037_p3, %p1036_p2 }
 0x15a   : > { %p1034_p1 = pneg %p1033_p0 }
 0x15c   : > { %p1039_p7 = pnand %p1038_p5, %p1034_p1 }
 0x15e   : > { %1042 = shalt.err (!%p1039_p7)  }
 0x15f   : > { %s1043_s17 = sshra.s32 %s347_s28, 4  ;;  %s1044_s17 = int_to_ptr.vmem [resolvable:$true] %s1043_s17 }
 0x160   : > { %s1045_s30 = scalar_lea.vmem %s1044_s17, 1  ;;  %p1050_p8 = scmp.lt.s32.totalorder %s1044_s17, [#allocation2] }
 0x161   : > { %p1046_p9 = scmp.ne.s32.totalorder %s1044_s17, %s1045_s30  ;;  %p1051_p13 = scmp.lt.s32.totalorder %s1363_s5, %s1045_s30 }
 0x163   : > { %p1047_p10 = pnand %p1046_p9, %p562_p11  ;;  %p1052_p6 = por %p1051_p13, %p1050_p8 }
 0x165   : > { %p1048_p12 = pneg %p1047_p10 }
 0x167   : > { %p1053_p0 = pnand %p1052_p6, %p1048_p12 }
 0x169   : > { %1056 = shalt.err (!%p1053_p0)  }
 0x16a   : > { %554 = dma.hbm_to_vmem [thread:$0]  (%p562_p11), %s345_s0, 16, %s347_s28, %s1351_s22 }
 0x16b   : > { %s55_s24 = scalar_lea.vmem [#allocation6], %s1184_s23  ;;  %s350_s6 = scalar_lea.sflag [#allocation3], %s1622_s11 }
 0x16c   : > { %1099 = dma.done.wait %s350_s6, 128 }
 0x16d   : > { %1100 = vsyncadd %s350_s6, 4294967168  ;;  %s512_s25 = sshll.u32 %s1622_s11, 3  ;;  %s1613_s12 = sshll.u32 %s1115_s15, 3 }
 0x16e   : > { %s383_s8 = scalar_lea.hbm %s1607_s2, %s1613_s12  ;;  %s385_s9 = sshll.u32 %s55_s24, 4  ;;  %s386_s9 = int_to_ptr.vmem [resolvable:$true] %s385_s9 }
 0x16f   : > { %s387_s10 = sshll.u32 %s383_s8, 4  ;;  %s369_s29 = scalar_lea.vmem [#allocation2], %s512_s25  ;;  %s388_s10 = int_to_ptr.hbm [resolvable:$true] %s387_s10 }
 0x170   : > { %v370_v0 = vld [vmem:[%s369_s29] sm:$0xff]  ;;  %s1614_s22 = sand.u32 1, %s1111_s14   ;;  %s1071_s28 = sshra.s32 %s388_s10, 4  ;;  %s1072_s28 = int_to_ptr.hbm [resolvable:$true] %s1071_s28 }
 0x171   : > { %371 = vst [vmem:[%s55_s24] sm:$0xff] %v370_v0  ;;  %s373_s23 = scalar_lea.sflag [#allocation7], %s1614_s22  ;;  %s1073_s4 = scalar_lea.hbm %s1072_s28, 8 }
 0x172   : > { %p1074_p11 = scmp.ne.s32.totalorder %s1072_s28, %s1073_s4  ;;  %s1077_s27 = scalar_lea.hbm %s1607_s2, 16 }
 0x173   : > { %p1078_p3 = scmp.lt.s32.totalorder %s1072_s28, %s1607_s2  ;;  %p1079_p5 = scmp.lt.s32.totalorder %s1077_s27, %s1073_s4 }
 0x174   : > { %p1075_p1 = pnand %p1074_p11, %p1172_p4 }
 0x175   : > { %p1080_p7 = por %p1079_p5, %p1078_p3 }
 0x176   : > { %p1076_p2 = pneg %p1075_p1 }
 0x178   : > { %p1081_p9 = pnand %p1080_p7, %p1076_p2 }
 0x17a   : > { %1084 = shalt.err (!%p1081_p9)
}
 0x17b   : > { %555 = dma.vmem_to_hbm [thread:$0]  (%p1172_p4), %s386_s9, 128, %s388_s10, %s373_s23  }
 0x17c PF: > { %p563_p10 = scmp.ge.s32.totalorder %s1115_s15, 1  ;;  %s399_s26 = sand.u32 1, %s1107_s13  }
 0x17d   : > { %p1615_p12 = scmp.ne.s32.totalorder %s1611_s21, 0  ;;  %s400_s17 = scalar_lea.sflag [#allocation7], %s399_s26 }
 0x17f   : > { %p558_p8 = pnand %p563_p10, %p1615_p12 }
 0x181   : > { %p559_p13 = pneg %p558_p8 }
 0x183   : > { %1102 = dma.done.wait (%p559_p13), %s400_s17, 128  }
 0x184   : > { %1104 = vsyncadd (%p559_p13), %s400_s17, 4294967168  ;;  %p20_p6 = scmp.ge.s32.totalorder %s1161_s16, 3   ;;  %s1616_s13 = smov %s1111_s14 }
 0x185   : > { %s1617_s14 = smov %s1170_s19  ;;  %s1618_s15 = smov %s1161_s16 }
 0x186   :  { %22 = sbr.rel (!%p20_p6) target bundleno = 9 (0x9), region = 151 }
 0x18b   :  { %406 = vsyncpa [#allocation7], 1 }
 0x18c   :  { %408 = vsyncpa [#allocation7 + $0x1], 1 }
 0x18d   :  { %409 = vsyncmov [#allocation3] }
 0x190   :  { %s410_s15 = vpop.sfrf %409 }
 0x191   :  { %p517_p4 = scmp.ne.s32.totalorder %s410_s15, 0 }
 0x193   :  { %414 = shalt.err (%p517_p4)  }
 0x194   :  { %416 = vsyncmov [#allocation3 + $0x1] }
 0x197   :  { %s417_s20 = vpop.sfrf %416 }
 0x198   :  { %p518_p0 = scmp.ne.s32.totalorder %s417_s20, 0 }
 0x19a   :  { %421 = shalt.err (%p518_p0)  }

</bundles_post_ra>
